<compile_context>
chip_gen: v7x
topology: tpu7x:2x2x1
jax: 0.10.0
libtpu: 0.0.40
codegen_flags: <defaults>
</compile_context>

<pallas_src>
import jax
import jax.numpy as jnp
from jax.experimental import pallas as pl
from jax.experimental.pallas import tpu as pltpu

_LANE = 128
_SUBLANE = 8
_MIN_SPLIT_ROWS = 256  # split a lone tile in two (for v7x's 2 TCs) only if each half >= this


def _round_up(n, m):
    return ((n + m - 1) // m) * m


def _cdiv(a, b):
    return (a + b - 1) // b


def _mlp_kernel(x_ref, w1_ref, w2_ref, w3_ref, w4_ref, w5_ref, b_ref, o_ref):
    """Fused 5-layer MLP tile. x_ref is bf16; b_ref rows 0..3 = b1, b2(+BN), b3, b4."""
    x = x_ref[...]                       # bf16 (tb, in_p)
    b = b_ref[...]                       # f32 (8, hid_p)

    # linear1 + ReLU
    h = jnp.dot(x, w1_ref[...], preferred_element_type=jnp.float32) + b[0:1, :]
    h = jnp.maximum(h, 0.0)

    # BatchNorm1d (eval mode): folded into w2/b2 in prepare_kernel_params.
    # linear2 + Tanh
    h = jnp.dot(h.astype(jnp.bfloat16), w2_ref[...],
                preferred_element_type=jnp.float32) + b[1:2, :]
    h = jnp.tanh(h)

    # Dropout(0.5): identity at inference.
    # TODO(synk): training-mode dropout (Bernoulli mask via pltpu.prng_*) not emitted.

    # linear3 + Sigmoid
    h = jnp.dot(h.astype(jnp.bfloat16), w3_ref[...],
                preferred_element_type=jnp.float32) + b[2:3, :]
    h = jax.nn.sigmoid(h)

    # submodule: Linear + ReLU + Linear(no bias)
    h = jnp.dot(h.astype(jnp.bfloat16), w4_ref[...],
                preferred_element_type=jnp.float32) + b[3:4, :]
    h = jnp.maximum(h, 0.0)
    o_ref[...] = jnp.dot(h.astype(jnp.bfloat16), w5_ref[...],
                         preferred_element_type=jnp.float32)


def init_params(key, input_dim, hidden_dim, output_dim):
    """Deterministic init matching the PyTorch module's parameter shapes.

    Linear weights are stored transposed: [in_features, out_features].
    """
    def linear_init(k, fan_in, fan_out, bias=True):
        kw, kb = jax.random.split(k)
        bound = 1.0 / jnp.sqrt(fan_in)
        w = jax.random.uniform(kw, (fan_in, fan_out), jnp.float32, -bound, bound)
        if not bias:
            return w, None
        b = jax.random.uniform(kb, (1, fan_out), jnp.float32, -bound, bound)
        return w, b

    k1, k2, k3, k4, k5 = jax.random.split(key, 5)
    w1, b1 = linear_init(k1, input_dim, hidden_dim)
    w2, b2 = linear_init(k2, hidden_dim, hidden_dim)
    w3, b3 = linear_init(k3, hidden_dim, hidden_dim)
    w4, b4 = linear_init(k4, hidden_dim, hidden_dim)
    w5, _ = linear_init(k5, hidden_dim, output_dim, bias=False)

    return {
        "w1": w1, "b1": b1,
        "w2": w2, "b2": b2,
        "w3": w3, "b3": b3,
        "w4": w4, "b4": b4,
        "w5": w5,
        # BatchNorm1d parameters / running stats (PyTorch defaults, eval mode)
        "gamma": jnp.ones((1, hidden_dim), jnp.float32),
        "beta": jnp.zeros((1, hidden_dim), jnp.float32),
        "running_mean": jnp.zeros((1, hidden_dim), jnp.float32),
        "running_var": jnp.ones((1, hidden_dim), jnp.float32),
    }


def prepare_kernel_params(params, eps=1e-5):
    """Fold eval-mode BN into linear2, pad features to 128 lanes, pack biases, cast to bf16.

    BN sits *after* the ReLU, so it cannot be folded into linear1. But
    BN(r) @ w2 + b2 = r @ (scale[:,None]*w2) + (shift @ w2 + b2)   (exact).

    PADDING INVARIANT (correctness): padded hidden lanes of h3 hold
    sigmoid(0)=0.5, which is non-zero; they are killed ONLY because the padded
    ROWS of w4 are exactly zero. w4's padded rows are re-zeroed explicitly
    below — do not change that without rethinking the padding scheme.
    """
    scale = params["gamma"] * jax.lax.rsqrt(params["running_var"] + eps)  # (1, H)
    shift = params["beta"] - params["running_mean"] * scale               # (1, H)
    w2f = scale.reshape(-1, 1) * params["w2"]
    b2f = params["b2"] + shift @ params["w2"]

    in_dim, hid = params["w1"].shape
    out_dim = params["w5"].shape[1]
    in_p = _round_up(in_dim, _LANE)
    hid_p = _round_up(hid, _LANE)
    out_p = _round_up(out_dim, _LANE)

    def pad_w(w, rp, cp):
        r, c = w.shape
        return jnp.pad(w, ((0, rp - r), (0, cp - c))).astype(jnp.bfloat16)

    w4p = pad_w(params["w4"], hid_p, hid_p)
    w4p = w4p.at[hid:, :].set(0)   # enforce the padding invariant explicitly

    # Pack the four biases into one (8, hid_p) f32 tile: rows 0..3 = b1, b2(+BN), b3, b4.
    bias = jnp.zeros((_SUBLANE, hid_p), jnp.float32)
    bias = bias.at[0, :hid].set(params["b1"][0])
    bias = bias.at[1, :hid].set(b2f[0])
    bias = bias.at[2, :hid].set(params["b3"][0])
    bias = bias.at[3, :hid].set(params["b4"][0])

    return {
        "w1": pad_w(params["w1"], in_p, hid_p),
        "w2": pad_w(w2f, hid_p, hid_p),
        "w3": pad_w(params["w3"], hid_p, hid_p),
        "w4": w4p,
        "w5": pad_w(params["w5"], hid_p, out_p),
        "bias": bias,
        "dims": (int(in_dim), int(hid), int(out_dim)),  # true (unpadded) dims
    }


def test_model_forward(x, kparams, *, block_batch=1024):
    """x: [batch, input_dim] float32. kparams: output of prepare_kernel_params."""
    batch, in_dim_x = x.shape
    in_dim, hid, out_dim = kparams["dims"]
    assert in_dim_x == in_dim
    in_p, hid_p = kparams["w1"].shape
    out_p = kparams["w5"].shape[1]

    # Batch tiling: tiles of multiple-of-8 rows that divide the 8-padded batch
    # evenly (no dead-row blowup), big enough to amortize the ~0.35 us/step
    # pipeline overhead; ensure >=2 "parallel" tiles for v7x's 2 TCs when the
    # batch is large enough to make the split worthwhile.
    batch_8 = _round_up(batch, _SUBLANE)
    n_tiles = _cdiv(batch_8, block_batch)
    if n_tiles == 1 and batch_8 >= 2 * _MIN_SPLIT_ROWS:
        n_tiles = 2
    tb = _round_up(_cdiv(batch_8, n_tiles), _SUBLANE)
    padded_batch = n_tiles * tb

    # x is the only per-tile HBM-streamed input: pad + cast to bf16 here so the
    # HBM->VMEM DMA moves half the bytes and the kernel needs no input cast.
    xp = jnp.pad(x, ((0, padded_batch - batch), (0, in_p - in_dim))).astype(jnp.bfloat16)

    weights = (kparams["w1"], kparams["w2"], kparams["w3"], kparams["w4"],
               kparams["w5"], kparams["bias"])
    args = (xp,) + weights

    # Advisory cost estimate from the TRUE (unpadded) dims.
    flops = 2 * batch * (in_dim * hid + 3 * hid * hid + hid * out_dim)
    const_bytes = sum(int(w.size) * w.dtype.itemsize for w in weights)
    cost = pl.CostEstimate(
        flops=flops,
        transcendentals=2 * batch * hid,             # tanh + sigmoid
        bytes_accessed=batch * in_dim * 2 + batch * out_dim * 4 + const_bytes)

    # Explicit VMEM budget: resident weights (assume worst-case double-buffered
    # for the fallback path) + double-buffered x/out tiles + live activations.
    # Capped at v7x's 64 MiB per-core VMEM.
    io_bytes = tb * in_p * 2 + tb * out_p * 4
    act_bytes = 4 * tb * hid_p * 4
    vmem_limit = min(64 << 20,
                     max(16 << 20,
                         int(1.5 * (2 * const_bytes + 2 * io_bytes + act_bytes))))
    # TODO(synk): if hidden_dim grows enough that resident bf16 weights exceed
    # this limit (~1-2k on v7x), switch to a hidden-dim grid axis + accumulator.

    def run(const_pipeline_mode):
        def const_spec(a):
            if const_pipeline_mode is None:
                return pl.BlockSpec(a.shape, lambda i: (0, 0))
            # Constant block index -> a single VMEM buffer is enough.
            return pl.BlockSpec(a.shape, lambda i: (0, 0),
                                pipeline_mode=const_pipeline_mode)

        in_specs = ([pl.BlockSpec((tb, in_p), lambda i: (i, 0))]
                    + [const_spec(w) for w in weights])
        return pl.pallas_call(
            _mlp_kernel,
            out_shape=jax.ShapeDtypeStruct((padded_batch, out_p), jnp.float32),
            grid=(padded_batch // tb,),
            in_specs=in_specs,
            out_specs=pl.BlockSpec((tb, out_p), lambda i: (i, 0)),
            compiler_params=pltpu.CompilerParams(
                dimension_semantics=("parallel",),
                vmem_limit_bytes=vmem_limit),
            cost_estimate=cost,
        )(*args)

    try:
        out = run(pl.Buffered(1))
    except Exception:
        # Fallback: default double-buffering if single-buffered constants are
        # not supported by this JAX/Mosaic version.
        out = run(None)

    return out[:batch, :out_dim]


def reference_forward(x, params):
    """Pure-JAX f32 reference (eval-mode semantics, unfolded/unpadded params)."""
    eps = 1e-5
    h = jnp.maximum(x @ params["w1"] + params["b1"], 0.0)
    h = (h - params["running_mean"]) * jax.lax.rsqrt(params["running_var"] + eps)
    h = h * params["gamma"] + params["beta"]
    h = jnp.tanh(h @ params["w2"] + params["b2"])
    h = jax.nn.sigmoid(h @ params["w3"] + params["b3"])
    h = jnp.maximum(h @ params["w4"] + params["b4"], 0.0)
    return h @ params["w5"]


if __name__ == "__main__":
    batch, input_dim, hidden_dim, output_dim = 8, 32, 32, 16

    key = jax.random.PRNGKey(0)
    kx, kp = jax.random.split(key)
    x = jax.random.normal(kx, (batch, input_dim), jnp.float32)
    params = init_params(kp, input_dim, hidden_dim, output_dim)
    kparams = prepare_kernel_params(params)

    out = test_model_forward(x, kparams)
    out = jax.block_until_ready(out)

    ref = reference_forward(x, params)
    assert out.shape == (batch, output_dim), out.shape
    # bf16 MXU inputs / bf16-streamed x with f32 accumulation vs f32 reference.
    assert jnp.allclose(out, ref, atol=3e-2, rtol=3e-2), "mismatch vs reference"

    print("KERNEL_OK")
</pallas_src>

<mosaic_0001>
module attributes {stable_mosaic.version = 11 : i64} {
  func.func @_mlp_kernel(%arg0: i32, %arg1: memref<8x128xbf16, #tpu.memory_space<vmem>>, %arg2: memref<128x128xbf16, #tpu.memory_space<vmem>>, %arg3: memref<128x128xbf16, #tpu.memory_space<vmem>>, %arg4: memref<128x128xbf16, #tpu.memory_space<vmem>>, %arg5: memref<128x128xbf16, #tpu.memory_space<vmem>>, %arg6: memref<128x128xbf16, #tpu.memory_space<vmem>>, %arg7: memref<8x128xf32, #tpu.memory_space<vmem>>, %arg8: memref<8x128xf32, #tpu.memory_space<vmem>>) attributes {dimension_semantics = [#tpu.dimension_semantics<parallel>], iteration_bounds = array<i64: 1>, scalar_prefetch = 0 : i64, scratch_operands = 0 : i64, tpu.core_type = #tpu.core_type<tc>, window_params = [{transform_indices = @transform_0, window_bounds = array<i64: 8, 128>}, {pipeline_mode = #tpu.pipeline_mode<synchronous>, transform_indices = @transform_1, window_bounds = array<i64: 128, 128>}, {pipeline_mode = #tpu.pipeline_mode<synchronous>, transform_indices = @transform_2, window_bounds = array<i64: 128, 128>}, {pipeline_mode = #tpu.pipeline_mode<synchronous>, transform_indices = @transform_3, window_bounds = array<i64: 128, 128>}, {pipeline_mode = #tpu.pipeline_mode<synchronous>, transform_indices = @transform_4, window_bounds = array<i64: 128, 128>}, {pipeline_mode = #tpu.pipeline_mode<synchronous>, transform_indices = @transform_5, window_bounds = array<i64: 128, 128>}, {pipeline_mode = #tpu.pipeline_mode<synchronous>, transform_indices = @transform_6, window_bounds = array<i64: 8, 128>}, {transform_indices = @transform_7, window_bounds = array<i64: 8, 128>}]} {
    %c0 = arith.constant 0 : index
    %c0_0 = arith.constant 0 : index
    %0 = vector.load %arg1[%c0, %c0_0] : memref<8x128xbf16, #tpu.memory_space<vmem>>, vector<8x128xbf16>
    %c0_1 = arith.constant 0 : index
    %c0_2 = arith.constant 0 : index
    %1 = vector.load %arg7[%c0_1, %c0_2] : memref<8x128xf32, #tpu.memory_space<vmem>>, vector<8x128xf32>
    %c0_3 = arith.constant 0 : index
    %c0_4 = arith.constant 0 : index
    %2 = vector.load %arg2[%c0_3, %c0_4] : memref<128x128xbf16, #tpu.memory_space<vmem>>, vector<128x128xbf16>
    %cst = arith.constant dense<0.000000e+00> : vector<8x128xf32>
    %3 = tpu.matmul %0, %2, %cst {dimension_numbers = #tpu.dot_dimension_numbers<[1], [0], [0], [1], [0, 0, 1, 1], [], []>} : vector<8x128xbf16>, vector<128x128xbf16>, vector<8x128xf32> -> vector<8x128xf32>
    %4 = vector.extract_strided_slice %1 {offsets = [0, 0], sizes = [1, 128], strides = [1, 1]} : vector<8x128xf32> to vector<1x128xf32>
    %5 = vector.broadcast %4 : vector<1x128xf32> to vector<8x128xf32>
    %6 = arith.addf %3, %5 : vector<8x128xf32>
    %cst_5 = arith.constant 0.000000e+00 : f32
    %7 = vector.broadcast %cst_5 : f32 to vector<8x128xf32>
    %8 = arith.maximumf %6, %7 : vector<8x128xf32>
    %9 = arith.truncf %8 : vector<8x128xf32> to vector<8x128xbf16>
    %c0_6 = arith.constant 0 : index
    %c0_7 = arith.constant 0 : index
    %10 = vector.load %arg3[%c0_6, %c0_7] : memref<128x128xbf16, #tpu.memory_space<vmem>>, vector<128x128xbf16>
    %cst_8 = arith.constant dense<0.000000e+00> : vector<8x128xf32>
    %11 = tpu.matmul %9, %10, %cst_8 {dimension_numbers = #tpu.dot_dimension_numbers<[1], [0], [0], [1], [0, 0, 1, 1], [], []>} : vector<8x128xbf16>, vector<128x128xbf16>, vector<8x128xf32> -> vector<8x128xf32>
    %12 = vector.extract_strided_slice %1 {offsets = [1, 0], sizes = [1, 128], strides = [1, 1]} : vector<8x128xf32> to vector<1x128xf32>
    %13 = vector.broadcast %12 : vector<1x128xf32> to vector<8x128xf32>
    %14 = arith.addf %11, %13 : vector<8x128xf32>
    %15 = math.tanh %14 : vector<8x128xf32>
    %16 = arith.truncf %15 : vector<8x128xf32> to vector<8x128xbf16>
    %c0_9 = arith.constant 0 : index
    %c0_10 = arith.constant 0 : index
    %17 = vector.load %arg4[%c0_9, %c0_10] : memref<128x128xbf16, #tpu.memory_space<vmem>>, vector<128x128xbf16>
    %cst_11 = arith.constant dense<0.000000e+00> : vector<8x128xf32>
    %18 = tpu.matmul %16, %17, %cst_11 {dimension_numbers = #tpu.dot_dimension_numbers<[1], [0], [0], [1], [0, 0, 1, 1], [], []>} : vector<8x128xbf16>, vector<128x128xbf16>, vector<8x128xf32> -> vector<8x128xf32>
    %19 = vector.extract_strided_slice %1 {offsets = [2, 0], sizes = [1, 128], strides = [1, 1]} : vector<8x128xf32> to vector<1x128xf32>
    %20 = vector.broadcast %19 : vector<1x128xf32> to vector<8x128xf32>
    %21 = arith.addf %18, %20 : vector<8x128xf32>
    %22 = arith.negf %21 : vector<8x128xf32>
    %23 = math.exp %22 : vector<8x128xf32>
    %cst_12 = arith.constant 1.000000e+00 : f32
    %24 = vector.broadcast %cst_12 : f32 to vector<8x128xf32>
    %25 = arith.addf %24, %23 : vector<8x128xf32>
    %26 = arith.divf %24, %25 : vector<8x128xf32>
    %27 = arith.truncf %26 : vector<8x128xf32> to vector<8x128xbf16>
    %c0_13 = arith.constant 0 : index
    %c0_14 = arith.constant 0 : index
    %28 = vector.load %arg5[%c0_13, %c0_14] : memref<128x128xbf16, #tpu.memory_space<vmem>>, vector<128x128xbf16>
    %cst_15 = arith.constant dense<0.000000e+00> : vector<8x128xf32>
    %29 = tpu.matmul %27, %28, %cst_15 {dimension_numbers = #tpu.dot_dimension_numbers<[1], [0], [0], [1], [0, 0, 1, 1], [], []>} : vector<8x128xbf16>, vector<128x128xbf16>, vector<8x128xf32> -> vector<8x128xf32>
    %30 = vector.extract_strided_slice %1 {offsets = [3, 0], sizes = [1, 128], strides = [1, 1]} : vector<8x128xf32> to vector<1x128xf32>
    %31 = vector.broadcast %30 : vector<1x128xf32> to vector<8x128xf32>
    %32 = arith.addf %29, %31 : vector<8x128xf32>
    %cst_16 = arith.constant 0.000000e+00 : f32
    %33 = vector.broadcast %cst_16 : f32 to vector<8x128xf32>
    %34 = arith.maximumf %32, %33 : vector<8x128xf32>
    %35 = arith.truncf %34 : vector<8x128xf32> to vector<8x128xbf16>
    %c0_17 = arith.constant 0 : index
    %c0_18 = arith.constant 0 : index
    %36 = vector.load %arg6[%c0_17, %c0_18] : memref<128x128xbf16, #tpu.memory_space<vmem>>, vector<128x128xbf16>
    %cst_19 = arith.constant dense<0.000000e+00> : vector<8x128xf32>
    %37 = tpu.matmul %35, %36, %cst_19 {dimension_numbers = #tpu.dot_dimension_numbers<[1], [0], [0], [1], [0, 0, 1, 1], [], []>} : vector<8x128xbf16>, vector<128x128xbf16>, vector<8x128xf32> -> vector<8x128xf32>
    %c0_20 = arith.constant 0 : index
    %c0_21 = arith.constant 0 : index
    %38 = vector.load %arg8[%c0_20, %c0_21] : memref<8x128xf32, #tpu.memory_space<vmem>>, vector<8x128xf32>
    tpu.vector_store %arg8[%c0_20, %c0_21], %37 {strides = array<i32>} : memref<8x128xf32, #tpu.memory_space<vmem>>, vector<8x128xf32>,
    return
  }
  func.func @transform_0(%arg0: i32) -> (i32, i32) {
    %c0_i32 = arith.constant 0 : i32
    %c0_i32_0 = arith.constant 0 : i32
    return %arg0, %c0_i32 : i32, i32
  }
  func.func @transform_1(%arg0: i32) -> (i32, i32) {
    %c0_i32 = arith.constant 0 : i32
    %c0_i32_0 = arith.constant 0 : i32
    %c0_i32_1 = arith.constant 0 : i32
    return %c0_i32, %c0_i32_0 : i32, i32
  }
  func.func @transform_2(%arg0: i32) -> (i32, i32) {
    %c0_i32 = arith.constant 0 : i32
    %c0_i32_0 = arith.constant 0 : i32
    %c0_i32_1 = arith.constant 0 : i32
    return %c0_i32, %c0_i32_0 : i32, i32
  }
  func.func @transform_3(%arg0: i32) -> (i32, i32) {
    %c0_i32 = arith.constant 0 : i32
    %c0_i32_0 = arith.constant 0 : i32
    %c0_i32_1 = arith.constant 0 : i32
    return %c0_i32, %c0_i32_0 : i32, i32
  }
  func.func @transform_4(%arg0: i32) -> (i32, i32) {
    %c0_i32 = arith.constant 0 : i32
    %c0_i32_0 = arith.constant 0 : i32
    %c0_i32_1 = arith.constant 0 : i32
    return %c0_i32, %c0_i32_0 : i32, i32
  }
  func.func @transform_5(%arg0: i32) -> (i32, i32) {
    %c0_i32 = arith.constant 0 : i32
    %c0_i32_0 = arith.constant 0 : i32
    %c0_i32_1 = arith.constant 0 : i32
    return %c0_i32, %c0_i32_0 : i32, i32
  }
  func.func @transform_6(%arg0: i32) -> (i32, i32) {
    %c0_i32 = arith.constant 0 : i32
    %c0_i32_0 = arith.constant 0 : i32
    %c0_i32_1 = arith.constant 0 : i32
    return %c0_i32, %c0_i32_0 : i32, i32
  }
  func.func @transform_7(%arg0: i32) -> (i32, i32) {
    %c0_i32 = arith.constant 0 : i32
    %c0_i32_0 = arith.constant 0 : i32
    return %arg0, %c0_i32 : i32, i32
  }
}

module attributes {stable_mosaic.version = 11 : i64} {
  func.func @_mlp_kernel(%arg0: i32, %arg1: memref<8x128xbf16, #tpu.memory_space<vmem>>, %arg2: memref<128x128xbf16, #tpu.memory_space<vmem>>, %arg3: memref<128x128xbf16, #tpu.memory_space<vmem>>, %arg4: memref<128x128xbf16, #tpu.memory_space<vmem>>, %arg5: memref<128x128xbf16, #tpu.memory_space<vmem>>, %arg6: memref<128x128xbf16, #tpu.memory_space<vmem>>, %arg7: memref<8x128xf32, #tpu.memory_space<vmem>>, %arg8: memref<8x128xf32, #tpu.memory_space<vmem>>) attributes {dimension_semantics = [#tpu.dimension_semantics<parallel>], iteration_bounds = array<i64: 1>, scalar_prefetch = 0 : i64, scratch_operands = 0 : i64, tpu.core_type = #tpu.core_type<tc>, window_params = [{transform_indices = @transform_0, window_bounds = array<i64: 8, 128>}, {pipeline_mode = #tpu.pipeline_mode<synchronous>, transform_indices = @transform_1, window_bounds = array<i64: 128, 128>}, {pipeline_mode = #tpu.pipeline_mode<synchronous>, transform_indices = @transform_2, window_bounds = array<i64: 128, 128>}, {pipeline_mode = #tpu.pipeline_mode<synchronous>, transform_indices = @transform_3, window_bounds = array<i64: 128, 128>}, {pipeline_mode = #tpu.pipeline_mode<synchronous>, transform_indices = @transform_4, window_bounds = array<i64: 128, 128>}, {pipeline_mode = #tpu.pipeline_mode<synchronous>, transform_indices = @transform_5, window_bounds = array<i64: 128, 128>}, {pipeline_mode = #tpu.pipeline_mode<synchronous>, transform_indices = @transform_6, window_bounds = array<i64: 8, 128>}, {transform_indices = @transform_7, window_bounds = array<i64: 8, 128>}]} {
    %c0 = arith.constant 0 : index
    %c0_0 = arith.constant 0 : index
    %0 = vector.load %arg1[%c0, %c0_0] : memref<8x128xbf16, #tpu.memory_space<vmem>>, vector<8x128xbf16>
    %c0_1 = arith.constant 0 : index
    %c0_2 = arith.constant 0 : index
    %1 = vector.load %arg7[%c0_1, %c0_2] : memref<8x128xf32, #tpu.memory_space<vmem>>, vector<8x128xf32>
    %c0_3 = arith.constant 0 : index
    %c0_4 = arith.constant 0 : index
    %2 = vector.load %arg2[%c0_3, %c0_4] : memref<128x128xbf16, #tpu.memory_space<vmem>>, vector<128x128xbf16>
    %cst = arith.constant dense<0.000000e+00> : vector<8x128xf32>
    %3 = tpu.matmul %0, %2, %cst {dimension_numbers = #tpu.dot_dimension_numbers<[1], [0], [0], [1], [0, 0, 1, 1], [], []>} : vector<8x128xbf16>, vector<128x128xbf16>, vector<8x128xf32> -> vector<8x128xf32>
    %4 = vector.extract_strided_slice %1 {offsets = [0, 0], sizes = [1, 128], strides = [1, 1]} : vector<8x128xf32> to vector<1x128xf32>
    %5 = vector.broadcast %4 : vector<1x128xf32> to vector<8x128xf32>
    %6 = arith.addf %3, %5 : vector<8x128xf32>
    %cst_5 = arith.constant 0.000000e+00 : f32
    %7 = vector.broadcast %cst_5 : f32 to vector<8x128xf32>
    %8 = arith.maximumf %6, %7 : vector<8x128xf32>
    %9 = arith.truncf %8 : vector<8x128xf32> to vector<8x128xbf16>
    %c0_6 = arith.constant 0 : index
    %c0_7 = arith.constant 0 : index
    %10 = vector.load %arg3[%c0_6, %c0_7] : memref<128x128xbf16, #tpu.memory_space<vmem>>, vector<128x128xbf16>
    %cst_8 = arith.constant dense<0.000000e+00> : vector<8x128xf32>
    %11 = tpu.matmul %9, %10, %cst_8 {dimension_numbers = #tpu.dot_dimension_numbers<[1], [0], [0], [1], [0, 0, 1, 1], [], []>} : vector<8x128xbf16>, vector<128x128xbf16>, vector<8x128xf32> -> vector<8x128xf32>
    %12 = vector.extract_strided_slice %1 {offsets = [1, 0], sizes = [1, 128], strides = [1, 1]} : vector<8x128xf32> to vector<1x128xf32>
    %13 = vector.broadcast %12 : vector<1x128xf32> to vector<8x128xf32>
    %14 = arith.addf %11, %13 : vector<8x128xf32>
    %15 = math.tanh %14 : vector<8x128xf32>
    %16 = arith.truncf %15 : vector<8x128xf32> to vector<8x128xbf16>
    %c0_9 = arith.constant 0 : index
    %c0_10 = arith.constant 0 : index
    %17 = vector.load %arg4[%c0_9, %c0_10] : memref<128x128xbf16, #tpu.memory_space<vmem>>, vector<128x128xbf16>
    %cst_11 = arith.constant dense<0.000000e+00> : vector<8x128xf32>
    %18 = tpu.matmul %16, %17, %cst_11 {dimension_numbers = #tpu.dot_dimension_numbers<[1], [0], [0], [1], [0, 0, 1, 1], [], []>} : vector<8x128xbf16>, vector<128x128xbf16>, vector<8x128xf32> -> vector<8x128xf32>
    %19 = vector.extract_strided_slice %1 {offsets = [2, 0], sizes = [1, 128], strides = [1, 1]} : vector<8x128xf32> to vector<1x128xf32>
    %20 = vector.broadcast %19 : vector<1x128xf32> to vector<8x128xf32>
    %21 = arith.addf %18, %20 : vector<8x128xf32>
    %22 = arith.negf %21 : vector<8x128xf32>
    %23 = math.exp %22 : vector<8x128xf32>
    %cst_12 = arith.constant 1.000000e+00 : f32
    %24 = vector.broadcast %cst_12 : f32 to vector<8x128xf32>
    %25 = arith.addf %24, %23 : vector<8x128xf32>
    %26 = arith.divf %24, %25 : vector<8x128xf32>
    %27 = arith.truncf %26 : vector<8x128xf32> to vector<8x128xbf16>
    %c0_13 = arith.constant 0 : index
    %c0_14 = arith.constant 0 : index
    %28 = vector.load %arg5[%c0_13, %c0_14] : memref<128x128xbf16, #tpu.memory_space<vmem>>, vector<128x128xbf16>
    %cst_15 = arith.constant dense<0.000000e+00> : vector<8x128xf32>
    %29 = tpu.matmul %27, %28, %cst_15 {dimension_numbers = #tpu.dot_dimension_numbers<[1], [0], [0], [1], [0, 0, 1, 1], [], []>} : vector<8x128xbf16>, vector<128x128xbf16>, vector<8x128xf32> -> vector<8x128xf32>
    %30 = vector.extract_strided_slice %1 {offsets = [3, 0], sizes = [1, 128], strides = [1, 1]} : vector<8x128xf32> to vector<1x128xf32>
    %31 = vector.broadcast %30 : vector<1x128xf32> to vector<8x128xf32>
    %32 = arith.addf %29, %31 : vector<8x128xf32>
    %cst_16 = arith.constant 0.000000e+00 : f32
    %33 = vector.broadcast %cst_16 : f32 to vector<8x128xf32>
    %34 = arith.maximumf %32, %33 : vector<8x128xf32>
    %35 = arith.truncf %34 : vector<8x128xf32> to vector<8x128xbf16>
    %c0_17 = arith.constant 0 : index
    %c0_18 = arith.constant 0 : index
    %36 = vector.load %arg6[%c0_17, %c0_18] : memref<128x128xbf16, #tpu.memory_space<vmem>>, vector<128x128xbf16>
    %cst_19 = arith.constant dense<0.000000e+00> : vector<8x128xf32>
    %37 = tpu.matmul %35, %36, %cst_19 {dimension_numbers = #tpu.dot_dimension_numbers<[1], [0], [0], [1], [0, 0, 1, 1], [], []>} : vector<8x128xbf16>, vector<128x128xbf16>, vector<8x128xf32> -> vector<8x128xf32>
    %c0_20 = arith.constant 0 : index
    %c0_21 = arith.constant 0 : index
    %38 = vector.load %arg8[%c0_20, %c0_21] : memref<8x128xf32, #tpu.memory_space<vmem>>, vector<8x128xf32>
    tpu.vector_store %arg8[%c0_20, %c0_21], %37 {strides = array<i32>} : memref<8x128xf32, #tpu.memory_space<vmem>>, vector<8x128xf32>,
    return
  }
  func.func @transform_0(%arg0: i32) -> (i32, i32) {
    %c0_i32 = arith.constant 0 : i32
    %c0_i32_0 = arith.constant 0 : i32
    return %arg0, %c0_i32 : i32, i32
  }
  func.func @transform_1(%arg0: i32) -> (i32, i32) {
    %c0_i32 = arith.constant 0 : i32
    %c0_i32_0 = arith.constant 0 : i32
    %c0_i32_1 = arith.constant 0 : i32
    return %c0_i32, %c0_i32_0 : i32, i32
  }
  func.func @transform_2(%arg0: i32) -> (i32, i32) {
    %c0_i32 = arith.constant 0 : i32
    %c0_i32_0 = arith.constant 0 : i32
    %c0_i32_1 = arith.constant 0 : i32
    return %c0_i32, %c0_i32_0 : i32, i32
  }
  func.func @transform_3(%arg0: i32) -> (i32, i32) {
    %c0_i32 = arith.constant 0 : i32
    %c0_i32_0 = arith.constant 0 : i32
    %c0_i32_1 = arith.constant 0 : i32
    return %c0_i32, %c0_i32_0 : i32, i32
  }
  func.func @transform_4(%arg0: i32) -> (i32, i32) {
    %c0_i32 = arith.constant 0 : i32
    %c0_i32_0 = arith.constant 0 : i32
    %c0_i32_1 = arith.constant 0 : i32
    return %c0_i32, %c0_i32_0 : i32, i32
  }
  func.func @transform_5(%arg0: i32) -> (i32, i32) {
    %c0_i32 = arith.constant 0 : i32
    %c0_i32_0 = arith.constant 0 : i32
    %c0_i32_1 = arith.constant 0 : i32
    return %c0_i32, %c0_i32_0 : i32, i32
  }
  func.func @transform_6(%arg0: i32) -> (i32, i32) {
    %c0_i32 = arith.constant 0 : i32
    %c0_i32_0 = arith.constant 0 : i32
    %c0_i32_1 = arith.constant 0 : i32
    return %c0_i32, %c0_i32_0 : i32, i32
  }
  func.func @transform_7(%arg0: i32) -> (i32, i32) {
    %c0_i32 = arith.constant 0 : i32
    %c0_i32_0 = arith.constant 0 : i32
    return %arg0, %c0_i32 : i32, i32
  }
}

</mosaic_0001>

<bundles_post_ra>
// kernel: tpu_custom_call.1
= control target key start
LH: loop header
LB: loop body
LE: loop exit
PB: predicated region body
PF: predicated region fallthrough
CT: control target
= control target key end

     0   :  { %12 = vsyncpa [#allocation3], 0  ;;  %s1300_s0 = inlined_call_operand.hbm [shape: bf16[8,128], index: 0, kind: input, shape index: {}]   ;;  %s1301_s1 = inlined_call_operand.hbm [shape: bf16[128,128], index: 1, kind: input, shape index: {}]   ;;  %s1302_s2 = inlined_call_operand.hbm [shape: bf16[128,128], index: 2, kind: input, shape index: {}]   ;;  %s1303_s3 = inlined_call_operand.hbm [shape: bf16[128,128], index: 3, kind: input, shape index: {}]   ;;  %s1304_s4 = inlined_call_operand.hbm [shape: bf16[128,128], index: 4, kind: input, shape index: {}]   ;;  %s1305_s5 = inlined_call_operand.hbm [shape: bf16[128,128], index: 5, kind: input, shape index: {}]   ;;  %s1306_s6 = inlined_call_operand.vmem [shape: f32[8,128], index: 6, kind: input, shape index: {}]   ;;  %s1307_s7 = inlined_call_operand.hbm [shape: f32[8,128], index: 7, kind: output, shape index: {}]  }
   0x1   :  { %13 = vsyncpa [#allocation6], 0 }
   0x2   :  { %14 = vsyncpa [#allocation9], 0 }
   0x3   :  { %15 = vsyncpa [#allocation12], 0 }
   0x4   :  { %16 = vsyncpa [#allocation4], 0  ;;  %s1085_s24 = smov [#allocation5]   ;;  %s921_s28 = scalar_lea.hbm %s1301_s1, 1024 }
   0x5   :  { %s32_s25 = sshll.u32 %s1085_s24, 4  ;;  %p922_p0 = scmp.ne.s32.totalorder %s1301_s1, %s921_s28  ;;  %s33_s25 = int_to_ptr.vmem [resolvable:$true] %s32_s25 }
   0x6   :  { %p925_p1 = scmp.lt.u32.totalorder %s921_s28, %s1301_s1 }
   0x8   :  { %p927_p2 = pnand %p925_p1, %p922_p0 }
   0xa   :  { %930 = shalt.err (!%p927_p2)
}
   0xb   :  { %s931_s10 = scalar_lea.vmem %s33_s25, 1024  ;;  %p936_p4 = scmp.lt.s32.totalorder %s33_s25, %s33_s25 }
   0xc   :  { %p932_p3 = scmp.ne.s32.totalorder %s33_s25, %s931_s10  ;;  %p937_p5 = scmp.lt.s32.totalorder %s931_s10, %s931_s10 }
   0xe   :  { %p938_p6 = por %p937_p5, %p936_p4 }
  0x10   :  { %p939_p7 = pnand %p938_p6, %p932_p3 }
  0x12   :  { %942 = shalt.err (!%p939_p7)
}
  0x13   :  { %s1086_s11 = smov 64   ;;  %s1087_s12 = smov 4  }
  0x14   :  { %38 = dma.hbm_to_vmem [thread:$0]  %s1301_s1, 1024, %s33_s25, [#allocation6], %s1086_s11, %s1086_s11, %s1087_s12  }
  0x15   :  { %s1088_s15 = smov [#allocation8]   ;;  %s1089_s17 = smov [#allocation2]  }
  0x16   :  { %s56_s16 = sshll.u32 %s1088_s15, 4  ;;  %s23_s18 = sshll.u32 %s1089_s17, 4  ;;  %s57_s16 = int_to_ptr.vmem [resolvable:$true] %s56_s16  ;;  %s24_s18 = int_to_ptr.vmem [resolvable:$true] %s23_s18 }
  0x17   :  { %s943_s21 = scalar_lea.hbm %s1303_s3, 1024 }
  0x18   :  { %p944_p8 = scmp.ne.s32.totalorder %s1303_s3, %s943_s21  ;;  %p947_p9 = scmp.lt.u32.totalorder %s943_s21, %s1303_s3 }
  0x1a   :  { %p949_p10 = pnand %p947_p9, %p944_p8 }
  0x1c   :  { %952 = shalt.err (!%p949_p10)
}
  0x1d   :  { %s953_s1 = scalar_lea.vmem %s57_s16, 1024  ;;  %p958_p12 = scmp.lt.s32.totalorder %s57_s16, %s57_s16 }
  0x1e   :  { %p954_p11 = scmp.ne.s32.totalorder %s57_s16, %s953_s1  ;;  %p959_p13 = scmp.lt.s32.totalorder %s953_s1, %s953_s1 }
  0x20   :  { %p960_p0 = por %p959_p13, %p958_p12 }
  0x22   :  { %p961_p1 = pnand %p960_p0, %p954_p11 }
  0x24   :  { %964 = shalt.err (!%p961_p1)
}
  0x25   :  { %62 = dma.hbm_to_vmem [thread:$0]  %s1303_s3, 1024, %s57_s16, [#allocation9], %s1086_s11, %s1086_s11, %s1087_s12  }
  0x26   :  { %s965_s30 = scalar_lea.hbm %s1300_s0, 64 }
  0x27   :  { %p966_p2 = scmp.ne.s32.totalorder %s1300_s0, %s965_s30  ;;  %p969_p3 = scmp.lt.u32.totalorder %s965_s30, %s1300_s0 }
  0x29   :  { %p971_p4 = pnand %p969_p3, %p966_p2 }
  0x2b   :  { %974 = shalt.err (!%p971_p4)
}
  0x2c   :  { %s975_s14 = scalar_lea.vmem %s24_s18, 64  ;;  %p980_p6 = scmp.lt.s32.totalorder %s24_s18, %s24_s18 }
  0x2d   :  { %p976_p5 = scmp.ne.s32.totalorder %s24_s18, %s975_s14  ;;  %p981_p7 = scmp.lt.s32.totalorder %s975_s14, %s975_s14 }
  0x2f   :  { %p982_p8 = por %p981_p7, %p980_p6 }
  0x31   :  { %p983_p9 = pnand %p982_p8, %p976_p5 }
  0x33   :  { %986 = shalt.err (!%p983_p9)
}
  0x34   :  { %26 = dma.hbm_to_vmem [thread:$0]  %s1300_s0, 64, %s24_s18, [#allocation3]  }
  0x35   :  { %s1090_s16 = smov [#allocation7]   ;;  %s1091_s19 = smov [#allocation10]  }
  0x36   :  { %s44_s17 = sshll.u32 %s1090_s16, 4  ;;  %s68_s20 = sshll.u32 %s1091_s19, 4  ;;  %s45_s17 = int_to_ptr.vmem [resolvable:$true] %s44_s17  ;;  %s69_s20 = int_to_ptr.vmem [resolvable:$true] %s68_s20 }
  0x37   :  { %s987_s23 = scalar_lea.hbm %s1302_s2, 1024 }
  0x38   :  { %p988_p10 = scmp.ne.s32.totalorder %s1302_s2, %s987_s23  ;;  %p991_p11 = scmp.lt.u32.totalorder %s987_s23, %s1302_s2 }
  0x3a   :  { %p993_p12 = pnand %p991_p11, %p988_p10 }
  0x3c   :  { %996 = shalt.err (!%p993_p12)
}
  0x3d   :  { %s997_s0 = scalar_lea.vmem %s45_s17, 1024  ;;  %p1002_p0 = scmp.lt.s32.totalorder %s45_s17, %s45_s17 }
  0x3e   :  { %p998_p13 = scmp.ne.s32.totalorder %s45_s17, %s997_s0  ;;  %p1003_p1 = scmp.lt.s32.totalorder %s997_s0, %s997_s0 }
  0x40   :  { %p1004_p2 = por %p1003_p1, %p1002_p0 }
  0x42   :  { %p1005_p3 = pnand %p1004_p2, %p998_p13 }
  0x44   :  { %1008 = shalt.err (!%p1005_p3)
}
  0x45   :  { %50 = dma.hbm_to_vmem [thread:$0]  %s1302_s2, 1024, %s45_s17, [#allocation6], %s1086_s11, %s1086_s11, %s1087_s12  }
  0x46   :  { %s1009_s30 = scalar_lea.hbm %s1304_s4, 1024 }
  0x47   :  { %p1010_p4 = scmp.ne.s32.totalorder %s1304_s4, %s1009_s30  ;;  %p1013_p5 = scmp.lt.u32.totalorder %s1009_s30, %s1304_s4 }
  0x49   :  { %p1015_p6 = pnand %p1013_p5, %p1010_p4 }
  0x4b   :  { %1018 = shalt.err (!%p1015_p6)
}
  0x4c   :  { %s1019_s14 = scalar_lea.vmem %s69_s20, 1024  ;;  %p1024_p8 = scmp.lt.s32.totalorder %s69_s20, %s69_s20 }
  0x4d   :  { %p1020_p7 = scmp.ne.s32.totalorder %s69_s20, %s1019_s14  ;;  %p1025_p9 = scmp.lt.s32.totalorder %s1019_s14, %s1019_s14 }
  0x4f   :  { %p1026_p10 = por %p1025_p9, %p1024_p8 }
  0x51   :  { %p1027_p11 = pnand %p1026_p10, %p1020_p7 }
  0x53   :  { %1030 = shalt.err (!%p1027_p11)
}
  0x54   :  { %74 = dma.hbm_to_vmem [thread:$0]  %s1304_s4, 1024, %s69_s20, [#allocation9], %s1086_s11, %s1086_s11, %s1087_s12  }
  0x55   :  { %s1092_s15 = smov [#allocation11]   ;;  %s1031_s21 = scalar_lea.hbm %s1305_s5, 1024 }
  0x56   :  { %s80_s16 = sshll.u32 %s1092_s15, 4  ;;  %p1032_p12 = scmp.ne.s32.totalorder %s1305_s5, %s1031_s21  ;;  %s81_s16 = int_to_ptr.vmem [resolvable:$true] %s80_s16 }
  0x57   :  { %p1035_p13 = scmp.lt.u32.totalorder %s1031_s21, %s1305_s5 }
  0x59   :  { %p1037_p0 = pnand %p1035_p13, %p1032_p12 }
  0x5b   :  { %1040 = shalt.err (!%p1037_p0)
}
  0x5c   :  { %s1041_s1 = scalar_lea.vmem %s81_s16, 1024  ;;  %p1046_p2 = scmp.lt.s32.totalorder %s81_s16, %s81_s16 }
  0x5d   :  { %p1042_p1 = scmp.ne.s32.totalorder %s81_s16, %s1041_s1  ;;  %p1047_p3 = scmp.lt.s32.totalorder %s1041_s1, %s1041_s1 }
  0x5f   :  { %p1048_p4 = por %p1047_p3, %p1046_p2 }
  0x61   :  { %p1049_p5 = pnand %p1048_p4, %p1042_p1 }
  0x63   :  { %1052 = shalt.err (!%p1049_p5)
}
  0x64   :  { %86 = dma.hbm_to_vmem [thread:$0]  %s1305_s5, 1024, %s81_s16, [#allocation12], %s1086_s11, %s1086_s11, %s1087_s12  }
  0x65   :  { %1075 = dma.done.wait [#allocation3], 64  }
  0x66   :  { %1076 = vsyncadd [#allocation3], 4294967232 }
  0x67   :  { %1077 = dma.done.wait [#allocation6], 2048  }
  0x68   :  { %1078 = vsyncadd [#allocation6], 4294965248 }
  0x69   :  { %1079 = dma.done.wait [#allocation9], 2048  }
  0x6a   :  { %1080 = vsyncadd [#allocation9], 4294965248 }
  0x6b   :  { %1081 = dma.done.wait [#allocation12], 1024  }
  0x6c   :  { %1082 = vsyncadd [#allocation12], 4294966272  ;;  %v1093_v0 = vmov 0.0   ;;  %vm1094_vm0 = vmmov 0   ;;  %v875_v1 = vld [vmem:[#allocation5] sm:$0xff]   ;;  %v876_v2 = vld [vmem:[#allocation5 + $0x8] sm:$0xff]   ;;  %v126_v22 = vlaneseq }
  0x6d   :  { %764 = vmatprep.subr.bf16.mxu0 %v1093_v0  ;;  %780 = vmatprep.mubr.msk.bf16.mxu0 %vm1094_vm0, %v1093_v0  ;;  %v877_v3 = vld [vmem:[#allocation5 + $0x10] sm:$0xff]   ;;  %v883_v4 = vld [vmem:[#allocation7] sm:$0xff]   ;;  %v878_v5 = vld [vmem:[#allocation5 + $0x18] sm:$0xff]  }
  0x6e   :  { %784 = vmatprep.subr.bf16.mxu1 %v1093_v0  ;;  %800 = vmatprep.mubr.msk.bf16.mxu1 %vm1094_vm0, %v1093_v0  ;;  %v884_v6 = vld [vmem:[#allocation7 + $0x8] sm:$0xff]   ;;  %v879_v7 = vld [vmem:[#allocation5 + $0x20] sm:$0xff]   ;;  %v885_v8 = vld [vmem:[#allocation7 + $0x10] sm:$0xff]   ;;  %v1251_v23 = vshrl.u32 %v126_v22, 7 }
  0x6f   :  { %765 = vmatpush3.bf16.msra.mxu0 %v875_v1  ;;  %785 = vmatpush3.bf16.msra.mxu1 %v883_v4  ;;  %v880_v9 = vld [vmem:[#allocation5 + $0x28] sm:$0xff]   ;;  %v886_v10 = vld [vmem:[#allocation7 + $0x18] sm:$0xff]   ;;  %v881_v11 = vld [vmem:[#allocation5 + $0x30] sm:$0xff]  }
  0x70   :  { %766 = vmatprep.subr.bf16.mxu0 %v1093_v0  ;;  %786 = vmatprep.subr.bf16.mxu1 %v1093_v0  ;;  %v887_v12 = vld [vmem:[#allocation7 + $0x20] sm:$0xff]   ;;  %v882_v13 = vld [vmem:[#allocation5 + $0x38] sm:$0xff]   ;;  %v888_v14 = vld [vmem:[#allocation7 + $0x28] sm:$0xff]   ;;  %v128_v24 = vsub.s32 0, %v1251_v23  ;;  %v238_v38 = vsub.s32 1, %v1251_v23  ;;  %v348_v61 = vsub.s32 2, %v1251_v23 }
  0x71   :  { %v108_v15 = vld [vmem:[#allocation2] sm:$0xf]  ;;  %v889_v16 = vld [vmem:[#allocation7 + $0x30] sm:$0xff]   ;;  %v891_v18 = vld [vmem:[#allocation8] sm:$0xff]  }
  0x72   :  { %v890_v17 = vld [vmem:[#allocation7 + $0x38] sm:$0xff]   ;;  %v892_v19 = vld [vmem:[#allocation8 + $0x8] sm:$0xff]   ;;  %v893_v20 = vld [vmem:[#allocation8 + $0x10] sm:$0xff]  }
  0x73   :  { %767 = vmatpush3.bf16.msra.mxu0 %v876_v2  ;;  %787 = vmatpush3.bf16.msra.mxu1 %v884_v6  ;;  %v894_v21 = vld [vmem:[#allocation8 + $0x18] sm:$0xff]   ;;  %v895_v34 = vld [vmem:[#allocation8 + $0x20] sm:$0xff]   ;;  %v896_v35 = vld [vmem:[#allocation8 + $0x28] sm:$0xff]  }
  0x74   :  { %768 = vmatprep.subr.bf16.mxu0 %v1093_v0  ;;  %788 = vmatprep.subr.bf16.mxu1 %v1093_v0  ;;  %v1257_v25 = vld [vmem:[%s1306_s6] sm:$0xff]  ;;  %v899_v47 = vld [vmem:[#allocation10] sm:$0xff]   ;;  %v900_v48 = vld [vmem:[#allocation10 + $0x8] sm:$0xff]   ;;  %s1095_s6 = smov [#allocation13]  }
  0x75   :  { %v129_v26 = vrot.slane %v1257_v25, %v128_v24  ;;  %v897_v36 = vld [vmem:[#allocation8 + $0x30] sm:$0xff]   ;;  %v898_v37 = vld [vmem:[#allocation8 + $0x38] sm:$0xff]   ;;  %v239_v39 = vrot.slane %v1257_v25, %v238_v38  ;;  %v903_v51 = vld [vmem:[#allocation10 + $0x20] sm:$0xff]   ;;  %v349_v62 = vrot.slane %v1257_v25, %v348_v61  ;;  %s666_s12 = sshll.u32 %s1095_s6, 4  ;;  %s667_s12 = int_to_ptr.vmem [resolvable:$true] %s666_s12 }
  0x76   :  { %v901_v49 = vld [vmem:[#allocation10 + $0x10] sm:$0xff]   ;;  %v902_v50 = vld [vmem:[#allocation10 + $0x18] sm:$0xff]   ;;  %v904_v52 = vld [vmem:[#allocation10 + $0x28] sm:$0xff]   ;;  %s1053_s25 = scalar_lea.vmem %s667_s12, 128  ;;  %p1058_p7 = scmp.lt.s32.totalorder %s667_s12, %s667_s12 }
  0x77   :  { %769 = vmatpush3.bf16.msra.mxu0 %v877_v3  ;;  %789 = vmatpush3.bf16.msra.mxu1 %v885_v8  ;;  %v905_v53 = vld [vmem:[#allocation10 + $0x30] sm:$0xff]   ;;  %v906_v54 = vld [vmem:[#allocation10 + $0x38] sm:$0xff]   ;;  %v907_v55 = vld [vmem:[#allocation11] sm:$0xff]   ;;  %p1054_p6 = scmp.ne.s32.totalorder %s667_s12, %s1053_s25  ;;  %p1059_p8 = scmp.lt.s32.totalorder %s1053_s25, %s1053_s25 }
  0x78   :  { %770 = vmatprep.subr.bf16.mxu0 %v1093_v0  ;;  %790 = vmatprep.subr.bf16.mxu1 %v1093_v0  ;;  %v908_v56 = vld [vmem:[#allocation11 + $0x8] sm:$0xff]   ;;  %v909_v57 = vld [vmem:[#allocation11 + $0x10] sm:$0xff]   ;;  %v910_v58 = vld [vmem:[#allocation11 + $0x18] sm:$0xff]  }
  0x79   :  { %v911_v59 = vld [vmem:[#allocation11 + $0x20] sm:$0xff]   ;;  %v912_v60 = vld [vmem:[#allocation11 + $0x28] sm:$0xff]   ;;  %p1060_p9 = por %p1059_p8, %p1058_p7 }
  0x7b   :  { %771 = vmatpush3.bf16.msra.mxu0 %v878_v5  ;;  %791 = vmatpush3.bf16.msra.mxu1 %v886_v10  ;;  %v913_v10 = vld [vmem:[#allocation11 + $0x30] sm:$0xff]   ;;  %p1061_p10 = pnand %p1060_p9, %p1054_p6 }
  0x7c   :  { %772 = vmatprep.subr.bf16.mxu0 %v1093_v0  ;;  %792 = vmatprep.subr.bf16.mxu1 %v1093_v0 }
  0x7f   :  { %773 = vmatpush3.bf16.msra.mxu0 %v879_v7  ;;  %793 = vmatpush3.bf16.msra.mxu1 %v887_v12  ;;  %v463_v12 = vsub.s32 3, %v1251_v23 }
  0x80   :  { %774 = vmatprep.subr.bf16.mxu0 %v1093_v0  ;;  %794 = vmatprep.subr.bf16.mxu1 %v1093_v0 }
  0x83   :  { %775 = vmatpush3.bf16.msra.mxu0 %v880_v9  ;;  %795 = vmatpush3.bf16.msra.mxu1 %v888_v14 }
  0x84   :  { %776 = vmatprep.subr.bf16.mxu0 %v1093_v0  ;;  %796 = vmatprep.subr.bf16.mxu1 %v1093_v0 }
  0x87   :  { %777 = vmatpush3.bf16.msra.mxu0 %v881_v11  ;;  %797 = vmatpush3.bf16.msra.mxu1 %v889_v16  ;;  %v914_v11 = vld [vmem:[#allocation11 + $0x38] sm:$0xff]  }
  0x88   :  { %778 = vmatprep.subr.bf16.mxu0 %v1093_v0  ;;  %798 = vmatprep.subr.bf16.mxu1 %v1093_v0 }
  0x8b   :  { %779 = vmatpush3.bf16.msra.mxu0 %v882_v13  ;;  %799 = vmatpush3.bf16.msra.mxu1 %v890_v17  ;;  %v464_v13 = vrot.slane %v1257_v25, %v463_v12 }
  0x8c   :  { %804 = vmatprep.subr.bf16.mxu0 %v1093_v0  ;;  %824 = vmatprep.subr.bf16.mxu1 %v1093_v0 }
  0x8e   :  { %781 = vmatmul.mubr.bf16.vlgmr.msra.gmra.mrb[0].mxu0 %v108_v15 }
  0x8f   :  { %820 = vmatprep.mubr.msk.bf16.mxu0 %vm1094_vm0, %v1093_v0  ;;  %805 = vmatpush3.bf16.msra.mxu0 %v891_v18 }
  0x90   :  { %806 = vmatprep.subr.bf16.mxu0 %v1093_v0 }
  0x93   :  { %807 = vmatpush3.bf16.msra.mxu0 %v892_v19 }
  0x94   :  { %808 = vmatprep.subr.bf16.mxu0 %v1093_v0 }
  0x97   :  { %809 = vmatpush3.bf16.msra.mxu0 %v893_v20 }
  0x98   :  { %810 = vmatprep.subr.bf16.mxu0 %v1093_v0 }
  0x9b   :  { %811 = vmatpush3.bf16.msra.mxu0 %v894_v21 }
  0x9c   :  { %812 = vmatprep.subr.bf16.mxu0 %v1093_v0 }
  0x9f   :  { %813 = vmatpush3.bf16.msra.mxu0 %v895_v34 }
  0xa0   :  { %814 = vmatprep.subr.bf16.mxu0 %v1093_v0 }
  0xa3   :  { %815 = vmatpush3.bf16.msra.mxu0 %v896_v35 }
  0xa4   :  { %816 = vmatprep.subr.bf16.mxu0 %v1093_v0 }
  0xa7   :  { %817 = vmatpush3.bf16.msra.mxu0 %v897_v36 }
  0xa8   :  { %818 = vmatprep.subr.bf16.mxu0 %v1093_v0 }
  0xab   :  { %819 = vmatpush3.bf16.msra.mxu0 %v898_v37 }
  0xac   :  { %844 = vmatprep.subr.bf16.mxu0 %v1093_v0 }
 0x161   :  { %v212_v27 = vpop.f32.mrb[0].mxu0 }
 0x162   :  { %v213_v28 = vadd.f32 %v212_v27, %v129_v26  ;;  %v782_v29 = vpop.f32.mrb[1].mxu0 }
 0x163   :  { %v215_v30 = vpop.f32.mrb[2].mxu0 }
 0x164   :  { %v218_v31 = vmax.f32 %v213_v28, 0.0  ;;  %v783_v32 = vpop.f32.mrb[3].mxu0 }
 0x166   :  { %v219_v33 = vpack.c.bf16 %v218_v31, %v218_v31 }
 0x168   :  { %801 = vmatmul.mubr.bf16.vlgmr.msra.gmra.mrb[0].mxu1 %v219_v33 }
 0x169   :  { %840 = vmatprep.mubr.msk.bf16.mxu1 %vm1094_vm0, %v1093_v0  ;;  %825 = vmatpush3.bf16.msra.mxu1 %v899_v47 }
 0x16a   :  { %826 = vmatprep.subr.bf16.mxu1 %v1093_v0 }
 0x16d   :  { %827 = vmatpush3.bf16.msra.mxu1 %v900_v48 }
 0x16e   :  { %828 = vmatprep.subr.bf16.mxu1 %v1093_v0 }
 0x171   :  { %829 = vmatpush3.bf16.msra.mxu1 %v901_v49 }
 0x172   :  { %830 = vmatprep.subr.bf16.mxu1 %v1093_v0 }
 0x175   :  { %831 = vmatpush3.bf16.msra.mxu1 %v902_v50 }
 0x176   :  { %832 = vmatprep.subr.bf16.mxu1 %v1093_v0 }
 0x179   :  { %833 = vmatpush3.bf16.msra.mxu1 %v903_v51 }
 0x17a   :  { %834 = vmatprep.subr.bf16.mxu1 %v1093_v0 }
 0x17d   :  { %835 = vmatpush3.bf16.msra.mxu1 %v904_v52 }
 0x17e   :  { %836 = vmatprep.subr.bf16.mxu1 %v1093_v0 }
 0x181   :  { %837 = vmatpush3.bf16.msra.mxu1 %v905_v53 }
 0x182   :  { %838 = vmatprep.subr.bf16.mxu1 %v1093_v0 }
 0x185   :  { %839 = vmatpush3.bf16.msra.mxu1 %v906_v54 }
 0x23b   :  { %v322_v40 = vpop.f32.mrb[0].mxu1 }
 0x23c   :  { %v323_v41 = vadd.f32 %v322_v40, %v239_v39  ;;  %v802_v42 = vpop.f32.mrb[1].mxu1 }
 0x23d   :  { %v325_v43 = vpop.f32.mrb[2].mxu1 }
 0x23e   :  { %915 = vtanh.f32 %v323_v41  ;;  %v803_v44 = vpop.f32.mrb[3].mxu1 }
 0x248   :  { %v916_v45 = vpop.eup %915 }
 0x249   :  { %v329_v46 = vpack.c.bf16 %v916_v45, %v916_v45 }
 0x24b   :  { %821 = vmatmul.mubr.bf16.vlgmr.msra.gmra.mrb[4].mxu0 %v329_v46 }
 0x24c   :  { %860 = vmatprep.mubr.msk.bf16.mxu0 %vm1094_vm0, %v1093_v0  ;;  %845 = vmatpush3.bf16.msra.mxu0 %v907_v55 }
 0x24d   :  { %846 = vmatprep.subr.bf16.mxu0 %v1093_v0 }
 0x250   :  { %847 = vmatpush3.bf16.msra.mxu0 %v908_v56 }
 0x251   :  { %848 = vmatprep.subr.bf16.mxu0 %v1093_v0 }
 0x254   :  { %849 = vmatpush3.bf16.msra.mxu0 %v909_v57 }
 0x255   :  { %850 = vmatprep.subr.bf16.mxu0 %v1093_v0 }
 0x258   :  { %851 = vmatpush3.bf16.msra.mxu0 %v910_v58 }
 0x259   :  { %852 = vmatprep.subr.bf16.mxu0 %v1093_v0 }
 0x25c   :  { %853 = vmatpush3.bf16.msra.mxu0 %v911_v59 }
 0x25d   :  { %854 = vmatprep.subr.bf16.mxu0 %v1093_v0 }
 0x260   :  { %855 = vmatpush3.bf16.msra.mxu0 %v912_v60 }
 0x261   :  { %856 = vmatprep.subr.bf16.mxu0 %v1093_v0 }
 0x264   :  { %857 = vmatpush3.bf16.msra.mxu0 %v913_v10 }
 0x265   :  { %858 = vmatprep.subr.bf16.mxu0 %v1093_v0 }
 0x268   :  { %859 = vmatpush3.bf16.msra.mxu0 %v914_v11 }
 0x31e   :  { %v432_v63 = vpop.f32.mrb[4].mxu0 }
 0x31f   :  { %v433_v1 = vadd.f32 %v432_v63, %v349_v62  ;;  %v822_v2 = vpop.f32.mrb[5].mxu0 }
 0x320   :  { %v435_v3 = vpop.f32.mrb[6].mxu0 }
 0x321   :  { %v702_v4 = vmul.f32 -1.442695, %v433_v1  ;;  %v823_v5 = vpop.f32.mrb[7].mxu0 }
 0x323   :  { %917 = vpow2.f32 %v702_v4 }
 0x32d   :  { %v918_v6 = vpop.eup %917 }
 0x32e   :  { %v441_v7 = vadd.f32 1.0, %v918_v6 }
 0x330   :  { %919 = vrcp.f32 %v441_v7 }
 0x33a   :  { %v920_v8 = vpop.eup %919 }
 0x33b   :  { %v444_v9 = vpack.c.bf16 %v920_v8, %v920_v8 }
 0x33d   :  { %841 = vmatmul.mubr.bf16.vlgmr.msra.gmra.mrb[4].mxu1 %v444_v9 }
 0x410   :  { %v547_v14 = vpop.f32.mrb[4].mxu1 }
 0x411   :  { %v548_v15 = vadd.f32 %v547_v14, %v464_v13  ;;  %v842_v16 = vpop.f32.mrb[5].mxu1 }
 0x412   :  { %v550_v17 = vpop.f32.mrb[6].mxu1 }
 0x413   :  { %v553_v18 = vmax.f32 %v548_v15, 0.0  ;;  %v843_v19 = vpop.f32.mrb[7].mxu1 }
 0x415   :  { %v554_v20 = vpack.c.bf16 %v553_v18, %v553_v18 }
 0x417   :  { %861 = vmatmul.mubr.bf16.vlgmr.msra.gmra.mrb[8].mxu0 %v554_v20 }
 0x4ea   :  { %v653_v21 = vpop.f32.mrb[8].mxu0 }
 0x4eb   :  { %659 = vst [vmem:[#allocation13] sm:$0xff] %v653_v21  ;;  %v862_v0 = vpop.f32.mrb[9].mxu0 }
 0x4ec   :  { %v656_v22 = vpop.f32.mrb[10].mxu0 }
 0x4ed   :  { %1064 = shalt.err (!%p1061_p10)
}
 0x4ee   :  { %s1065_s27 = scalar_lea.hbm %s1307_s7, 128 }
 0x4ef   :  { %p1066_p11 = scmp.ne.s32.totalorder %s1307_s7, %s1065_s27  ;;  %p1069_p12 = scmp.lt.u32.totalorder %s1065_s27, %s1307_s7 }
 0x4f1   :  { %p1071_p13 = pnand %p1069_p12, %p1066_p11 }
 0x4f3   :  { %1074 = shalt.err (!%p1071_p13)
}
 0x4f4   :  { %669 = dma.vmem_to_hbm [thread:$0]  %s667_s12, 128, %s1307_s7, [#allocation4]   ;;  %v863_v23 = vpop.f32.mrb[11].mxu0 }
 0x4f5   :  { %1083 = dma.done.wait [#allocation4], 128  }
 0x4f6   :  { %1084 = vsyncadd [#allocation4], 4294967168 }
 0x4f7   :  { %673 = vsyncpa [#allocation3], 1 }
 0x4f8   :  { %674 = vsyncpa [#allocation6], 1 }
 0x4f9   :  { %675 = vsyncpa [#allocation9], 1 }
 0x4fa   :  { %676 = vsyncpa [#allocation12], 1 }
 0x4fb   :  { %677 = vsyncpa [#allocation4], 1 }

// kernel: tpu_custom_call.1
= control target key start
LH: loop header
LB: loop body
LE: loop exit
PB: predicated region body
PF: predicated region fallthrough
CT: control target
= control target key end

     0   :  { %12 = vsyncpa [#allocation3], 0  ;;  %s1300_s0 = inlined_call_operand.hbm [shape: bf16[8,128], index: 0, kind: input, shape index: {}]   ;;  %s1301_s1 = inlined_call_operand.hbm [shape: bf16[128,128], index: 1, kind: input, shape index: {}]   ;;  %s1302_s2 = inlined_call_operand.hbm [shape: bf16[128,128], index: 2, kind: input, shape index: {}]   ;;  %s1303_s3 = inlined_call_operand.hbm [shape: bf16[128,128], index: 3, kind: input, shape index: {}]   ;;  %s1304_s4 = inlined_call_operand.hbm [shape: bf16[128,128], index: 4, kind: input, shape index: {}]   ;;  %s1305_s5 = inlined_call_operand.hbm [shape: bf16[128,128], index: 5, kind: input, shape index: {}]   ;;  %s1306_s6 = inlined_call_operand.vmem [shape: f32[8,128], index: 6, kind: input, shape index: {}]   ;;  %s1307_s7 = inlined_call_operand.hbm [shape: f32[8,128], index: 7, kind: output, shape index: {}]  }
   0x1   :  { %13 = vsyncpa [#allocation6], 0 }
   0x2   :  { %14 = vsyncpa [#allocation9], 0 }
   0x3   :  { %15 = vsyncpa [#allocation12], 0 }
   0x4   :  { %16 = vsyncpa [#allocation4], 0  ;;  %s1085_s24 = smov [#allocation5]   ;;  %s921_s28 = scalar_lea.hbm %s1301_s1, 1024 }
   0x5   :  { %s32_s25 = sshll.u32 %s1085_s24, 4  ;;  %p922_p0 = scmp.ne.s32.totalorder %s1301_s1, %s921_s28  ;;  %s33_s25 = int_to_ptr.vmem [resolvable:$true] %s32_s25 }
   0x6   :  { %p925_p1 = scmp.lt.u32.totalorder %s921_s28, %s1301_s1 }
   0x8   :  { %p927_p2 = pnand %p925_p1, %p922_p0 }
   0xa   :  { %930 = shalt.err (!%p927_p2)
}
   0xb   :  { %s931_s10 = scalar_lea.vmem %s33_s25, 1024  ;;  %p936_p4 = scmp.lt.s32.totalorder %s33_s25, %s33_s25 }
   0xc   :  { %p932_p3 = scmp.ne.s32.totalorder %s33_s25, %s931_s10  ;;  %p937_p5 = scmp.lt.s32.totalorder %s931_s10, %s931_s10 }
   0xe   :  { %p938_p6 = por %p937_p5, %p936_p4 }
  0x10   :  { %p939_p7 = pnand %p938_p6, %p932_p3 }
  0x12   :  { %942 = shalt.err (!%p939_p7)
}
  0x13   :  { %s1086_s11 = smov 64   ;;  %s1087_s12 = smov 4  }
  0x14   :  { %38 = dma.hbm_to_vmem [thread:$0]  %s1301_s1, 1024, %s33_s25, [#allocation6], %s1086_s11, %s1086_s11, %s1087_s12  }
  0x15   :  { %s1088_s15 = smov [#allocation8]   ;;  %s1089_s17 = smov [#allocation2]  }
  0x16   :  { %s56_s16 = sshll.u32 %s1088_s15, 4  ;;  %s23_s18 = sshll.u32 %s1089_s17, 4  ;;  %s57_s16 = int_to_ptr.vmem [resolvable:$true] %s56_s16  ;;  %s24_s18 = int_to_ptr.vmem [resolvable:$true] %s23_s18 }
  0x17   :  { %s943_s21 = scalar_lea.hbm %s1303_s3, 1024 }
  0x18   :  { %p944_p8 = scmp.ne.s32.totalorder %s1303_s3, %s943_s21  ;;  %p947_p9 = scmp.lt.u32.totalorder %s943_s21, %s1303_s3 }
  0x1a   :  { %p949_p10 = pnand %p947_p9, %p944_p8 }
  0x1c   :  { %952 = shalt.err (!%p949_p10)
}
  0x1d   :  { %s953_s1 = scalar_lea.vmem %s57_s16, 1024  ;;  %p958_p12 = scmp.lt.s32.totalorder %s57_s16, %s57_s16 }
  0x1e   :  { %p954_p11 = scmp.ne.s32.totalorder %s57_s16, %s953_s1  ;;  %p959_p13 = scmp.lt.s32.totalorder %s953_s1, %s953_s1 }
  0x20   :  { %p960_p0 = por %p959_p13, %p958_p12 }
  0x22   :  { %p961_p1 = pnand %p960_p0, %p954_p11 }
  0x24   :  { %964 = shalt.err (!%p961_p1)
}
  0x25   :  { %62 = dma.hbm_to_vmem [thread:$0]  %s1303_s3, 1024, %s57_s16, [#allocation9], %s1086_s11, %s1086_s11, %s1087_s12  }
  0x26   :  { %s965_s30 = scalar_lea.hbm %s1300_s0, 64 }
  0x27   :  { %p966_p2 = scmp.ne.s32.totalorder %s1300_s0, %s965_s30  ;;  %p969_p3 = scmp.lt.u32.totalorder %s965_s30, %s1300_s0 }
  0x29   :  { %p971_p4 = pnand %p969_p3, %p966_p2 }
  0x2b   :  { %974 = shalt.err (!%p971_p4)
}
  0x2c   :  { %s975_s14 = scalar_lea.vmem %s24_s18, 64  ;;  %p980_p6 = scmp.lt.s32.totalorder %s24_s18, %s24_s18 }
  0x2d   :  { %p976_p5 = scmp.ne.s32.totalorder %s24_s18, %s975_s14  ;;  %p981_p7 = scmp.lt.s32.totalorder %s975_s14, %s975_s14 }
  0x2f   :  { %p982_p8 = por %p981_p7, %p980_p6 }
  0x31   :  { %p983_p9 = pnand %p982_p8, %p976_p5 }
  0x33   :  { %986 = shalt.err (!%p983_p9)
}
  0x34   :  { %26 = dma.hbm_to_vmem [thread:$0]  %s1300_s0, 64, %s24_s18, [#allocation3]  }
  0x35   :  { %s1090_s16 = smov [#allocation7]   ;;  %s1091_s19 = smov [#allocation10]  }
  0x36   :  { %s44_s17 = sshll.u32 %s1090_s16, 4  ;;  %s68_s20 = sshll.u32 %s1091_s19, 4  ;;  %s45_s17 = int_to_ptr.vmem [resolvable:$true] %s44_s17  ;;  %s69_s20 = int_to_ptr.vmem [resolvable:$true] %s68_s20 }
  0x37   :  { %s987_s23 = scalar_lea.hbm %s1302_s2, 1024 }
  0x38   :  { %p988_p10 = scmp.ne.s32.totalorder %s1302_s2, %s987_s23  ;;  %p991_p11 = scmp.lt.u32.totalorder %s987_s23, %s1302_s2 }
  0x3a   :  { %p993_p12 = pnand %p991_p11, %p988_p10 }
  0x3c   :  { %996 = shalt.err (!%p993_p12)
}
  0x3d   :  { %s997_s0 = scalar_lea.vmem %s45_s17, 1024  ;;  %p1002_p0 = scmp.lt.s32.totalorder %s45_s17, %s45_s17 }
  0x3e   :  { %p998_p13 = scmp.ne.s32.totalorder %s45_s17, %s997_s0  ;;  %p1003_p1 = scmp.lt.s32.totalorder %s997_s0, %s997_s0 }
  0x40   :  { %p1004_p2 = por %p1003_p1, %p1002_p0 }
  0x42   :  { %p1005_p3 = pnand %p1004_p2, %p998_p13 }
  0x44   :  { %1008 = shalt.err (!%p1005_p3)
}
  0x45   :  { %50 = dma.hbm_to_vmem [thread:$0]  %s1302_s2, 1024, %s45_s17, [#allocation6], %s1086_s11, %s1086_s11, %s1087_s12  }
  0x46   :  { %s1009_s30 = scalar_lea.hbm %s1304_s4, 1024 }
  0x47   :  { %p1010_p4 = scmp.ne.s32.totalorder %s1304_s4, %s1009_s30  ;;  %p1013_p5 = scmp.lt.u32.totalorder %s1009_s30, %s1304_s4 }
  0x49   :  { %p1015_p6 = pnand %p1013_p5, %p1010_p4 }
  0x4b   :  { %1018 = shalt.err (!%p1015_p6)
}
  0x4c   :  { %s1019_s14 = scalar_lea.vmem %s69_s20, 1024  ;;  %p1024_p8 = scmp.lt.s32.totalorder %s69_s20, %s69_s20 }
  0x4d   :  { %p1020_p7 = scmp.ne.s32.totalorder %s69_s20, %s1019_s14  ;;  %p1025_p9 = scmp.lt.s32.totalorder %s1019_s14, %s1019_s14 }
  0x4f   :  { %p1026_p10 = por %p1025_p9, %p1024_p8 }
  0x51   :  { %p1027_p11 = pnand %p1026_p10, %p1020_p7 }
  0x53   :  { %1030 = shalt.err (!%p1027_p11)
}
  0x54   :  { %74 = dma.hbm_to_vmem [thread:$0]  %s1304_s4, 1024, %s69_s20, [#allocation9], %s1086_s11, %s1086_s11, %s1087_s12  }
  0x55   :  { %s1092_s15 = smov [#allocation11]   ;;  %s1031_s21 = scalar_lea.hbm %s1305_s5, 1024 }
  0x56   :  { %s80_s16 = sshll.u32 %s1092_s15, 4  ;;  %p1032_p12 = scmp.ne.s32.totalorder %s1305_s5, %s1031_s21  ;;  %s81_s16 = int_to_ptr.vmem [resolvable:$true] %s80_s16 }
  0x57   :  { %p1035_p13 = scmp.lt.u32.totalorder %s1031_s21, %s1305_s5 }
  0x59   :  { %p1037_p0 = pnand %p1035_p13, %p1032_p12 }
  0x5b   :  { %1040 = shalt.err (!%p1037_p0)
}
  0x5c   :  { %s1041_s1 = scalar_lea.vmem %s81_s16, 1024  ;;  %p1046_p2 = scmp.lt.s32.totalorder %s81_s16, %s81_s16 }
  0x5d   :  { %p1042_p1 = scmp.ne.s32.totalorder %s81_s16, %s1041_s1  ;;  %p1047_p3 = scmp.lt.s32.totalorder %s1041_s1, %s1041_s1 }
  0x5f   :  { %p1048_p4 = por %p1047_p3, %p1046_p2 }
  0x61   :  { %p1049_p5 = pnand %p1048_p4, %p1042_p1 }
  0x63   :  { %1052 = shalt.err (!%p1049_p5)
}
  0x64   :  { %86 = dma.hbm_to_vmem [thread:$0]  %s1305_s5, 1024, %s81_s16, [#allocation12], %s1086_s11, %s1086_s11, %s1087_s12  }
  0x65   :  { %1075 = dma.done.wait [#allocation3], 64  }
  0x66   :  { %1076 = vsyncadd [#allocation3], 4294967232 }
  0x67   :  { %1077 = dma.done.wait [#allocation6], 2048  }
  0x68   :  { %1078 = vsyncadd [#allocation6], 4294965248 }
  0x69   :  { %1079 = dma.done.wait [#allocation9], 2048  }
  0x6a   :  { %1080 = vsyncadd [#allocation9], 4294965248 }
  0x6b   :  { %1081 = dma.done.wait [#allocation12], 1024  }
  0x6c   :  { %1082 = vsyncadd [#allocation12], 4294966272  ;;  %v1093_v0 = vmov 0.0   ;;  %vm1094_vm0 = vmmov 0   ;;  %v875_v1 = vld [vmem:[#allocation5] sm:$0xff]   ;;  %v876_v2 = vld [vmem:[#allocation5 + $0x8] sm:$0xff]   ;;  %v126_v22 = vlaneseq }
  0x6d   :  { %764 = vmatprep.subr.bf16.mxu0 %v1093_v0  ;;  %780 = vmatprep.mubr.msk.bf16.mxu0 %vm1094_vm0, %v1093_v0  ;;  %v877_v3 = vld [vmem:[#allocation5 + $0x10] sm:$0xff]   ;;  %v883_v4 = vld [vmem:[#allocation7] sm:$0xff]   ;;  %v878_v5 = vld [vmem:[#allocation5 + $0x18] sm:$0xff]  }
  0x6e   :  { %784 = vmatprep.subr.bf16.mxu1 %v1093_v0  ;;  %800 = vmatprep.mubr.msk.bf16.mxu1 %vm1094_vm0, %v1093_v0  ;;  %v884_v6 = vld [vmem:[#allocation7 + $0x8] sm:$0xff]   ;;  %v879_v7 = vld [vmem:[#allocation5 + $0x20] sm:$0xff]   ;;  %v885_v8 = vld [vmem:[#allocation7 + $0x10] sm:$0xff]   ;;  %v1251_v23 = vshrl.u32 %v126_v22, 7 }
  0x6f   :  { %765 = vmatpush3.bf16.msra.mxu0 %v875_v1  ;;  %785 = vmatpush3.bf16.msra.mxu1 %v883_v4  ;;  %v880_v9 = vld [vmem:[#allocation5 + $0x28] sm:$0xff]   ;;  %v886_v10 = vld [vmem:[#allocation7 + $0x18] sm:$0xff]   ;;  %v881_v11 = vld [vmem:[#allocation5 + $0x30] sm:$0xff]  }
  0x70   :  { %766 = vmatprep.subr.bf16.mxu0 %v1093_v0  ;;  %786 = vmatprep.subr.bf16.mxu1 %v1093_v0  ;;  %v887_v12 = vld [vmem:[#allocation7 + $0x20] sm:$0xff]   ;;  %v882_v13 = vld [vmem:[#allocation5 + $0x38] sm:$0xff]   ;;  %v888_v14 = vld [vmem:[#allocation7 + $0x28] sm:$0xff]   ;;  %v128_v24 = vsub.s32 0, %v1251_v23  ;;  %v238_v38 = vsub.s32 1, %v1251_v23  ;;  %v348_v61 = vsub.s32 2, %v1251_v23 }
  0x71   :  { %v108_v15 = vld [vmem:[#allocation2] sm:$0xf]  ;;  %v889_v16 = vld [vmem:[#allocation7 + $0x30] sm:$0xff]   ;;  %v891_v18 = vld [vmem:[#allocation8] sm:$0xff]  }
  0x72   :  { %v890_v17 = vld [vmem:[#allocation7 + $0x38] sm:$0xff]   ;;  %v892_v19 = vld [vmem:[#allocation8 + $0x8] sm:$0xff]   ;;  %v893_v20 = vld [vmem:[#allocation8 + $0x10] sm:$0xff]  }
  0x73   :  { %767 = vmatpush3.bf16.msra.mxu0 %v876_v2  ;;  %787 = vmatpush3.bf16.msra.mxu1 %v884_v6  ;;  %v894_v21 = vld [vmem:[#allocation8 + $0x18] sm:$0xff]   ;;  %v895_v34 = vld [vmem:[#allocation8 + $0x20] sm:$0xff]   ;;  %v896_v35 = vld [vmem:[#allocation8 + $0x28] sm:$0xff]  }
  0x74   :  { %768 = vmatprep.subr.bf16.mxu0 %v1093_v0  ;;  %788 = vmatprep.subr.bf16.mxu1 %v1093_v0  ;;  %v1257_v25 = vld [vmem:[%s1306_s6] sm:$0xff]  ;;  %v899_v47 = vld [vmem:[#allocation10] sm:$0xff]   ;;  %v900_v48 = vld [vmem:[#allocation10 + $0x8] sm:$0xff]   ;;  %s1095_s6 = smov [#allocation13]  }
  0x75   :  { %v129_v26 = vrot.slane %v1257_v25, %v128_v24  ;;  %v897_v36 = vld [vmem:[#allocation8 + $0x30] sm:$0xff]   ;;  %v898_v37 = vld [vmem:[#allocation8 + $0x38] sm:$0xff]   ;;  %v239_v39 = vrot.slane %v1257_v25, %v238_v38  ;;  %v903_v51 = vld [vmem:[#allocation10 + $0x20] sm:$0xff]   ;;  %v349_v62 = vrot.slane %v1257_v25, %v348_v61  ;;  %s666_s12 = sshll.u32 %s1095_s6, 4  ;;  %s667_s12 = int_to_ptr.vmem [resolvable:$true] %s666_s12 }
  0x76   :  { %v901_v49 = vld [vmem:[#allocation10 + $0x10] sm:$0xff]   ;;  %v902_v50 = vld [vmem:[#allocation10 + $0x18] sm:$0xff]   ;;  %v904_v52 = vld [vmem:[#allocation10 + $0x28] sm:$0xff]   ;;  %s1053_s25 = scalar_lea.vmem %s667_s12, 128  ;;  %p1058_p7 = scmp.lt.s32.totalorder %s667_s12, %s667_s12 }
  0x77   :  { %769 = vmatpush3.bf16.msra.mxu0 %v877_v3  ;;  %789 = vmatpush3.bf16.msra.mxu1 %v885_v8  ;;  %v905_v53 = vld [vmem:[#allocation10 + $0x30] sm:$0xff]   ;;  %v906_v54 = vld [vmem:[#allocation10 + $0x38] sm:$0xff]   ;;  %v907_v55 = vld [vmem:[#allocation11] sm:$0xff]   ;;  %p1054_p6 = scmp.ne.s32.totalorder %s667_s12, %s1053_s25  ;;  %p1059_p8 = scmp.lt.s32.totalorder %s1053_s25, %s1053_s25 }
  0x78   :  { %770 = vmatprep.subr.bf16.mxu0 %v1093_v0  ;;  %790 = vmatprep.subr.bf16.mxu1 %v1093_v0  ;;  %v908_v56 = vld [vmem:[#allocation11 + $0x8] sm:$0xff]   ;;  %v909_v57 = vld [vmem:[#allocation11 + $0x10] sm:$0xff]   ;;  %v910_v58 = vld [vmem:[#allocation11 + $0x18] sm:$0xff]  }
  0x79   :  { %v911_v59 = vld [vmem:[#allocation11 + $0x20] sm:$0xff]   ;;  %v912_v60 = vld [vmem:[#allocation11 + $0x28] sm:$0xff]   ;;  %p1060_p9 = por %p1059_p8, %p1058_p7 }
  0x7b   :  { %771 = vmatpush3.bf16.msra.mxu0 %v878_v5  ;;  %791 = vmatpush3.bf16.msra.mxu1 %v886_v10  ;;  %v913_v10 = vld [vmem:[#allocation11 + $0x30] sm:$0xff]   ;;  %p1061_p10 = pnand %p1060_p9, %p1054_p6 }
  0x7c   :  { %772 = vmatprep.subr.bf16.mxu0 %v1093_v0  ;;  %792 = vmatprep.subr.bf16.mxu1 %v1093_v0 }
  0x7f   :  { %773 = vmatpush3.bf16.msra.mxu0 %v879_v7  ;;  %793 = vmatpush3.bf16.msra.mxu1 %v887_v12  ;;  %v463_v12 = vsub.s32 3, %v1251_v23 }
  0x80   :  { %774 = vmatprep.subr.bf16.mxu0 %v1093_v0  ;;  %794 = vmatprep.subr.bf16.mxu1 %v1093_v0 }
  0x83   :  { %775 = vmatpush3.bf16.msra.mxu0 %v880_v9  ;;  %795 = vmatpush3.bf16.msra.mxu1 %v888_v14 }
  0x84   :  { %776 = vmatprep.subr.bf16.mxu0 %v1093_v0  ;;  %796 = vmatprep.subr.bf16.mxu1 %v1093_v0 }
  0x87   :  { %777 = vmatpush3.bf16.msra.mxu0 %v881_v11  ;;  %797 = vmatpush3.bf16.msra.mxu1 %v889_v16  ;;  %v914_v11 = vld [vmem:[#allocation11 + $0x38] sm:$0xff]  }
  0x88   :  { %778 = vmatprep.subr.bf16.mxu0 %v1093_v0  ;;  %798 = vmatprep.subr.bf16.mxu1 %v1093_v0 }
  0x8b   :  { %779 = vmatpush3.bf16.msra.mxu0 %v882_v13  ;;  %799 = vmatpush3.bf16.msra.mxu1 %v890_v17  ;;  %v464_v13 = vrot.slane %v1257_v25, %v463_v12 }
  0x8c   :  { %804 = vmatprep.subr.bf16.mxu0 %v1093_v0  ;;  %824 = vmatprep.subr.bf16.mxu1 %v1093_v0 }
  0x8e   :  { %781 = vmatmul.mubr.bf16.vlgmr.msra.gmra.mrb[0].mxu0 %v108_v15 }
  0x8f   :  { %820 = vmatprep.mubr.msk.bf16.mxu0 %vm1094_vm0, %v1093_v0  ;;  %805 = vmatpush3.bf16.msra.mxu0 %v891_v18 }
  0x90   :  { %806 = vmatprep.subr.bf16.mxu0 %v1093_v0 }
  0x93   :  { %807 = vmatpush3.bf16.msra.mxu0 %v892_v19 }
  0x94   :  { %808 = vmatprep.subr.bf16.mxu0 %v1093_v0 }
  0x97   :  { %809 = vmatpush3.bf16.msra.mxu0 %v893_v20 }
  0x98   :  { %810 = vmatprep.subr.bf16.mxu0 %v1093_v0 }
  0x9b   :  { %811 = vmatpush3.bf16.msra.mxu0 %v894_v21 }
  0x9c   :  { %812 = vmatprep.subr.bf16.mxu0 %v1093_v0 }
  0x9f   :  { %813 = vmatpush3.bf16.msra.mxu0 %v895_v34 }
  0xa0   :  { %814 = vmatprep.subr.bf16.mxu0 %v1093_v0 }
  0xa3   :  { %815 = vmatpush3.bf16.msra.mxu0 %v896_v35 }
  0xa4   :  { %816 = vmatprep.subr.bf16.mxu0 %v1093_v0 }
  0xa7   :  { %817 = vmatpush3.bf16.msra.mxu0 %v897_v36 }
  0xa8   :  { %818 = vmatprep.subr.bf16.mxu0 %v1093_v0 }
  0xab   :  { %819 = vmatpush3.bf16.msra.mxu0 %v898_v37 }
  0xac   :  { %844 = vmatprep.subr.bf16.mxu0 %v1093_v0 }
 0x161   :  { %v212_v27 = vpop.f32.mrb[0].mxu0 }
 0x162   :  { %v213_v28 = vadd.f32 %v212_v27, %v129_v26  ;;  %v782_v29 = vpop.f32.mrb[1].mxu0 }
 0x163   :  { %v215_v30 = vpop.f32.mrb[2].mxu0 }
 0x164   :  { %v218_v31 = vmax.f32 %v213_v28, 0.0  ;;  %v783_v32 = vpop.f32.mrb[3].mxu0 }
 0x166   :  { %v219_v33 = vpack.c.bf16 %v218_v31, %v218_v31 }
 0x168   :  { %801 = vmatmul.mubr.bf16.vlgmr.msra.gmra.mrb[0].mxu1 %v219_v33 }
 0x169   :  { %840 = vmatprep.mubr.msk.bf16.mxu1 %vm1094_vm0, %v1093_v0  ;;  %825 = vmatpush3.bf16.msra.mxu1 %v899_v47 }
 0x16a   :  { %826 = vmatprep.subr.bf16.mxu1 %v1093_v0 }
 0x16d   :  { %827 = vmatpush3.bf16.msra.mxu1 %v900_v48 }
 0x16e   :  { %828 = vmatprep.subr.bf16.mxu1 %v1093_v0 }
 0x171   :  { %829 = vmatpush3.bf16.msra.mxu1 %v901_v49 }
 0x172   :  { %830 = vmatprep.subr.bf16.mxu1 %v1093_v0 }
 0x175   :  { %831 = vmatpush3.bf16.msra.mxu1 %v902_v50 }
 0x176   :  { %832 = vmatprep.subr.bf16.mxu1 %v1093_v0 }
 0x179   :  { %833 = vmatpush3.bf16.msra.mxu1 %v903_v51 }
 0x17a   :  { %834 = vmatprep.subr.bf16.mxu1 %v1093_v0 }
 0x17d   :  { %835 = vmatpush3.bf16.msra.mxu1 %v904_v52 }
 0x17e   :  { %836 = vmatprep.subr.bf16.mxu1 %v1093_v0 }
 0x181   :  { %837 = vmatpush3.bf16.msra.mxu1 %v905_v53 }
 0x182   :  { %838 = vmatprep.subr.bf16.mxu1 %v1093_v0 }
 0x185   :  { %839 = vmatpush3.bf16.msra.mxu1 %v906_v54 }
 0x23b   :  { %v322_v40 = vpop.f32.mrb[0].mxu1 }
 0x23c   :  { %v323_v41 = vadd.f32 %v322_v40, %v239_v39  ;;  %v802_v42 = vpop.f32.mrb[1].mxu1 }
 0x23d   :  { %v325_v43 = vpop.f32.mrb[2].mxu1 }
 0x23e   :  { %915 = vtanh.f32 %v323_v41  ;;  %v803_v44 = vpop.f32.mrb[3].mxu1 }
 0x248   :  { %v916_v45 = vpop.eup %915 }
 0x249   :  { %v329_v46 = vpack.c.bf16 %v916_v45, %v916_v45 }
 0x24b   :  { %821 = vmatmul.mubr.bf16.vlgmr.msra.gmra.mrb[4].mxu0 %v329_v46 }
 0x24c   :  { %860 = vmatprep.mubr.msk.bf16.mxu0 %vm1094_vm0, %v1093_v0  ;;  %845 = vmatpush3.bf16.msra.mxu0 %v907_v55 }
 0x24d   :  { %846 = vmatprep.subr.bf16.mxu0 %v1093_v0 }
 0x250   :  { %847 = vmatpush3.bf16.msra.mxu0 %v908_v56 }
 0x251   :  { %848 = vmatprep.subr.bf16.mxu0 %v1093_v0 }
 0x254   :  { %849 = vmatpush3.bf16.msra.mxu0 %v909_v57 }
 0x255   :  { %850 = vmatprep.subr.bf16.mxu0 %v1093_v0 }
 0x258   :  { %851 = vmatpush3.bf16.msra.mxu0 %v910_v58 }
 0x259   :  { %852 = vmatprep.subr.bf16.mxu0 %v1093_v0 }
 0x25c   :  { %853 = vmatpush3.bf16.msra.mxu0 %v911_v59 }
 0x25d   :  { %854 = vmatprep.subr.bf16.mxu0 %v1093_v0 }
 0x260   :  { %855 = vmatpush3.bf16.msra.mxu0 %v912_v60 }
 0x261   :  { %856 = vmatprep.subr.bf16.mxu0 %v1093_v0 }
 0x264   :  { %857 = vmatpush3.bf16.msra.mxu0 %v913_v10 }
 0x265   :  { %858 = vmatprep.subr.bf16.mxu0 %v1093_v0 }
 0x268   :  { %859 = vmatpush3.bf16.msra.mxu0 %v914_v11 }
 0x31e   :  { %v432_v63 = vpop.f32.mrb[4].mxu0 }
 0x31f   :  { %v433_v1 = vadd.f32 %v432_v63, %v349_v62  ;;  %v822_v2 = vpop.f32.mrb[5].mxu0 }
 0x320   :  { %v435_v3 = vpop.f32.mrb[6].mxu0 }
 0x321   :  { %v702_v4 = vmul.f32 -1.442695, %v433_v1  ;;  %v823_v5 = vpop.f32.mrb[7].mxu0 }
 0x323   :  { %917 = vpow2.f32 %v702_v4 }
 0x32d   :  { %v918_v6 = vpop.eup %917 }
 0x32e   :  { %v441_v7 = vadd.f32 1.0, %v918_v6 }
 0x330   :  { %919 = vrcp.f32 %v441_v7 }
 0x33a   :  { %v920_v8 = vpop.eup %919 }
 0x33b   :  { %v444_v9 = vpack.c.bf16 %v920_v8, %v920_v8 }
 0x33d   :  { %841 = vmatmul.mubr.bf16.vlgmr.msra.gmra.mrb[4].mxu1 %v444_v9 }
 0x410   :  { %v547_v14 = vpop.f32.mrb[4].mxu1 }
 0x411   :  { %v548_v15 = vadd.f32 %v547_v14, %v464_v13  ;;  %v842_v16 = vpop.f32.mrb[5].mxu1 }
 0x412   :  { %v550_v17 = vpop.f32.mrb[6].mxu1 }
 0x413   :  { %v553_v18 = vmax.f32 %v548_v15, 0.0  ;;  %v843_v19 = vpop.f32.mrb[7].mxu1 }
 0x415   :  { %v554_v20 = vpack.c.bf16 %v553_v18, %v553_v18 }
 0x417   :  { %861 = vmatmul.mubr.bf16.vlgmr.msra.gmra.mrb[8].mxu0 %v554_v20 }
 0x4ea   :  { %v653_v21 = vpop.f32.mrb[8].mxu0 }
 0x4eb   :  { %659 = vst [vmem:[#allocation13] sm:$0xff] %v653_v21  ;;  %v862_v0 = vpop.f32.mrb[9].mxu0 }
 0x4ec   :  { %v656_v22 = vpop.f32.mrb[10].mxu0 }
 0x4ed   :  { %1064 = shalt.err (!%p1061_p10)
}
 0x4ee   :  { %s1065_s27 = scalar_lea.hbm %s1307_s7, 128 }
 0x4ef   :  { %p1066_p11 = scmp.ne.s32.totalorder %s1307_s7, %s1065_s27  ;;  %p1069_p12 = scmp.lt.u32.totalorder %s1065_s27, %s1307_s7 }
 0x4f1   :  { %p1071_p13 = pnand %p1069_p12, %p1066_p11 }
 0x4f3   :  { %1074 = shalt.err (!%p1071_p13)
}
 0x4f4   :  { %669 = dma.vmem_to_hbm [thread:$0]  %s667_s12, 128, %s1307_s7, [#allocation4]   ;;  %v863_v23 = vpop.f32.mrb[11].mxu0 }
 0x4f5   :  { %1083 = dma.done.wait [#allocation4], 128  }
 0x4f6   :  { %1084 = vsyncadd [#allocation4], 4294967168 }
 0x4f7   :  { %673 = vsyncpa [#allocation3], 1 }
 0x4f8   :  { %674 = vsyncpa [#allocation6], 1 }
 0x4f9   :  { %675 = vsyncpa [#allocation9], 1 }
 0x4fa   :  { %676 = vsyncpa [#allocation12], 1 }
 0x4fb   :  { %677 = vsyncpa [#allocation4], 1 }

</bundles_post_ra>
